<compile_context>
chip_gen: v7x
topology: tpu7x:2x2x1
jax: 0.10.0
libtpu: 0.0.40
codegen_flags: <defaults>
</compile_context>

<pallas_src>
import jax
import jax.numpy as jnp
from jax.experimental import pallas as pl
from jax.experimental.pallas import tpu as pltpu


def _bce_with_logits(x, y):
    # numerically stable: max(x,0) - x*y + log(1 + exp(-|x|))
    return jnp.maximum(x, 0.0) - x * y + jnp.log(1.0 + jnp.exp(-jnp.abs(x)))


def bce3_kernel(pred_ref, gt_ref, maskr_ref, out_ref, acc_ref):
    j = pl.program_id(1)

    @pl.when(j == 0)
    def _init():
        acc_ref[...] = jnp.zeros_like(acc_ref)

    pred_a = pred_ref[0, 0]                                # (TR, LANE) f32 logits
    pred_v = pred_ref[0, 1]
    pred_vt = pred_ref[0, 2]
    # bf16 {0,1} targets -> widen immediately after load.
    gt_a = gt_ref[0, 0].astype(jnp.float32)
    gt_v = gt_ref[0, 1].astype(jnp.float32)
    gt_vt = gt_ref[0, 2].astype(jnp.float32)

    mask_r = maskr_ref[0]                                  # already torch.round()ed
    uncertain = jnp.maximum(gt_vt - gt_v - gt_a, 0.0)      # uncertain[uncertain<0]=0
    mask_unknown = jnp.maximum(mask_r - uncertain, 0.0)    # mask_unknown[<0]=0

    sel_u = mask_unknown > 0.5
    sel_m = mask_r > 0.0

    # Artery and vein share the same selection mask -> one select, one slab.
    bce_av = jnp.where(
        sel_u,
        _bce_with_logits(pred_a, gt_a) + _bce_with_logits(pred_v, gt_v),
        0.0)
    bce_vt = jnp.where(sel_m, _bce_with_logits(pred_vt, gt_vt), 0.0)

    # Pure VPU adds in the steady state; no per-step cross-lane reductions.
    acc_ref[0] += bce_av
    acc_ref[1] += bce_vt
    acc_ref[2] += sel_u.astype(jnp.float32)
    acc_ref[3] += sel_m.astype(jnp.float32)

    @pl.when(j == pl.num_programs(1) - 1)
    def _finalize():
        # Collapse the row (sublane) axis once per sample; lanes stay dense and
        # are summed (together with the batch axis) in plain JAX outside.
        out_ref[0] = jnp.sum(acc_ref[...], axis=1)


def bce3_loss(pred_vessels, vessels, mask, *, lane=512, max_rows=256,
              target_dtype=jnp.bfloat16):
    """pred_vessels, vessels: [N,3,H,W]; mask: [N,Cm,H,W] -> scalar f32 loss.

    target_dtype: dtype used to ship `vessels` through HBM.  bf16 is exact for
    {0,1} targets; pass jnp.float32 if the targets are non-binary soft labels.
    """
    n, c, h, w = pred_vessels.shape
    assert c == 3
    hw = h * w

    rows_needed = -(-hw // lane)                      # ceil(hw / lane)
    tr = min(max_rows, -(-rows_needed // 8) * 8)      # rows/tile: multiple of 8
    tile = tr * lane
    hwp = -(-hw // tile) * tile                       # pad so tr divides rows
    pad = hwp - hw
    r = hwp // lane
    n_sp = r // tr

    def prep3(x, dtype):
        x = x.reshape(n, 3, hw).astype(dtype)
        if pad:
            x = jnp.pad(x, ((0, 0), (0, 0), (0, pad)))   # padded pixels: gt==0
        return x.reshape(n, 3, r, lane)

    pred_p = prep3(pred_vessels, jnp.float32)         # (N, 3, R, LANE) f32
    gt_p = prep3(vessels, target_dtype)               # (N, 3, R, LANE) bf16
    # torch.round(mask[:, 0]) done here; fuses into the pad/reshape fusion.
    mask0 = jnp.round(mask[:, 0, :, :].astype(jnp.float32)).reshape(n, hw)
    if pad:
        mask0 = jnp.pad(mask0, ((0, 0), (0, pad)))    # padded pixels: mask==0
    mask_p = mask0.reshape(n, r, lane)                # (N, R, LANE) f32

    out = pl.pallas_call(
        bce3_kernel,
        out_shape=jax.ShapeDtypeStruct((n, 4, lane), jnp.float32),
        grid_spec=pltpu.PrefetchScalarGridSpec(
            num_scalar_prefetch=0,
            grid=(n, n_sp),
            in_specs=[
                pl.BlockSpec((1, 3, tr, lane), lambda i, j: (i, 0, j, 0)),
                pl.BlockSpec((1, 3, tr, lane), lambda i, j: (i, 0, j, 0)),
                pl.BlockSpec((1, tr, lane), lambda i, j: (i, j, 0)),
            ],
            out_specs=pl.BlockSpec((1, 4, lane), lambda i, j: (i, 0, 0)),
            scratch_shapes=[pltpu.VMEM((4, tr, lane), jnp.float32)],
        ),
        compiler_params=pltpu.CompilerParams(
            dimension_semantics=("parallel", "arbitrary")),
    )(pred_p, gt_p, mask_p)

    # partial = [sum(bce_a)+sum(bce_v), sum(bce_vt), cnt_unknown, cnt_mask]
    partial = jnp.sum(out, axis=(0, 2))
    # Matches BCEWithLogitsLoss(reduction='mean') on boolean-indexed pixels;
    # an empty selection divides by zero (inf/nan) exactly like the reference.
    return partial[0] / partial[2] + partial[1] / partial[3]


def _reference(pred_vessels, vessels, mask):
    """Pure-JAX reference matching the PyTorch forward exactly."""
    mask_r = jnp.round(mask[:, 0, :, :])
    pred_a, pred_v, pred_vt = (pred_vessels[:, i] for i in range(3))
    gt_a, gt_v, gt_vt = (vessels[:, i] for i in range(3))
    uncertain = jnp.maximum(gt_vt - gt_v - gt_a, 0.0)
    mask_unknown = jnp.maximum(mask_r - uncertain, 0.0)
    sel_u = mask_unknown > 0.5
    sel_m = mask_r > 0.0

    def masked_mean(x, y, sel):
        vals = _bce_with_logits(x, y)
        return jnp.sum(jnp.where(sel, vals, 0.0)) / jnp.sum(sel.astype(jnp.float32))

    return (masked_mean(pred_a, gt_a, sel_u)
            + masked_mean(pred_v, gt_v, sel_u)
            + masked_mean(pred_vt, gt_vt, sel_m))


if __name__ == "__main__":
    key = jax.random.PRNGKey(0)
    k1, k2, k3, k4 = jax.random.split(key, 4)

    N, H, W = 2, 16, 16
    # logits
    pred = jax.random.normal(k1, (N, 3, H, W), dtype=jnp.float32)
    # binary ground truth: artery, vein, and vessel tree ~ artery|vein
    gt_a = (jax.random.uniform(k2, (N, 1, H, W)) > 0.7).astype(jnp.float32)
    gt_v = (jax.random.uniform(k3, (N, 1, H, W)) > 0.7).astype(jnp.float32)
    gt_vt = jnp.clip(gt_a + gt_v, 0.0, 1.0)
    vessels = jnp.concatenate([gt_a, gt_v, gt_vt], axis=1)
    # fov mask in [0,1]; round() binarizes it (as in the PyTorch module)
    mask = jax.random.uniform(k4, (N, 1, H, W), dtype=jnp.float32)

    loss = jax.block_until_ready(bce3_loss(pred, vessels, mask))
    ref = _reference(pred, vessels, mask)
    assert jnp.allclose(loss, ref, rtol=1e-5, atol=1e-5), (loss, ref)
    print("KERNEL_OK")
</pallas_src>

<mosaic_0001>
module attributes {stable_mosaic.version = 11 : i64} {
  func.func @bce3_kernel(%arg0: i32, %arg1: i32, %arg2: memref<1x3x8x512xf32, #tpu.memory_space<vmem>>, %arg3: memref<1x3x8x512xbf16, #tpu.memory_space<vmem>>, %arg4: memref<1x8x512xf32, #tpu.memory_space<vmem>>, %arg5: memref<1x4x512xf32, #tpu.memory_space<vmem>>, %arg6: memref<4x8x512xf32, #tpu.memory_space<vmem>>) attributes {dimension_semantics = [#tpu.dimension_semantics<parallel>, #tpu.dimension_semantics<arbitrary>], iteration_bounds = array<i64: 2, 1>, scalar_prefetch = 0 : i64, scratch_operands = 1 : i64, tpu.core_type = #tpu.core_type<tc>, window_params = [{transform_indices = @transform_0, window_bounds = array<i64: 1, 3, 8, 512>}, {transform_indices = @transform_1, window_bounds = array<i64: 1, 3, 8, 512>}, {transform_indices = @transform_2, window_bounds = array<i64: 1, 8, 512>}, {transform_indices = @transform_3, window_bounds = array<i64: 1, 4, 512>}]} {
    %c0_i32 = arith.constant 0 : i32
    %0 = arith.cmpi eq, %arg1, %c0_i32 : i32
    %1 = arith.extui %0 : i1 to i32
    %c0_i32_0 = arith.constant 0 : i32
    %2 = arith.cmpi ne, %1, %c0_i32_0 : i32
    scf.if %2 {
      %cst_64 = arith.constant 0.000000e+00 : f32
      %103 = vector.broadcast %cst_64 : f32 to vector<4x8x512xf32>
      %c0_65 = arith.constant 0 : index
      %c0_66 = arith.constant 0 : index
      %c0_67 = arith.constant 0 : index
      %104 = vector.load %arg6[%c0_65, %c0_66, %c0_67] : memref<4x8x512xf32, #tpu.memory_space<vmem>>, vector<4x8x512xf32>
      tpu.vector_store %arg6[%c0_65, %c0_66, %c0_67], %103 {strides = array<i32>} : memref<4x8x512xf32, #tpu.memory_space<vmem>>, vector<4x8x512xf32>,
    } else {
    }
    %c0 = arith.constant 0 : index
    %c0_1 = arith.constant 0 : index
    %c0_2 = arith.constant 0 : index
    %c0_3 = arith.constant 0 : index
    %3 = vector.load %arg2[%c0, %c0_1, %c0_2, %c0_3] : memref<1x3x8x512xf32, #tpu.memory_space<vmem>>, vector<1x1x8x512xf32>
    %4 = vector.shape_cast %3 : vector<1x1x8x512xf32> to vector<8x512xf32>
    %c0_4 = arith.constant 0 : index
    %c1 = arith.constant 1 : index
    %c0_5 = arith.constant 0 : index
    %c0_6 = arith.constant 0 : index
    %5 = vector.load %arg2[%c0_4, %c1, %c0_5, %c0_6] : memref<1x3x8x512xf32, #tpu.memory_space<vmem>>, vector<1x1x8x512xf32>
    %6 = vector.shape_cast %5 : vector<1x1x8x512xf32> to vector<8x512xf32>
    %c0_7 = arith.constant 0 : index
    %c2 = arith.constant 2 : index
    %c0_8 = arith.constant 0 : index
    %c0_9 = arith.constant 0 : index
    %7 = vector.load %arg2[%c0_7, %c2, %c0_8, %c0_9] : memref<1x3x8x512xf32, #tpu.memory_space<vmem>>, vector<1x1x8x512xf32>
    %8 = vector.shape_cast %7 : vector<1x1x8x512xf32> to vector<8x512xf32>
    %c0_10 = arith.constant 0 : index
    %c0_11 = arith.constant 0 : index
    %c0_12 = arith.constant 0 : index
    %c0_13 = arith.constant 0 : index
    %9 = vector.load %arg3[%c0_10, %c0_11, %c0_12, %c0_13] : memref<1x3x8x512xbf16, #tpu.memory_space<vmem>>, vector<1x1x8x512xbf16>
    %10 = vector.shape_cast %9 : vector<1x1x8x512xbf16> to vector<8x512xbf16>
    %11 = arith.extf %10 : vector<8x512xbf16> to vector<8x512xf32>
    %c0_14 = arith.constant 0 : index
    %c1_15 = arith.constant 1 : index
    %c0_16 = arith.constant 0 : index
    %c0_17 = arith.constant 0 : index
    %12 = vector.load %arg3[%c0_14, %c1_15, %c0_16, %c0_17] : memref<1x3x8x512xbf16, #tpu.memory_space<vmem>>, vector<1x1x8x512xbf16>
    %13 = vector.shape_cast %12 : vector<1x1x8x512xbf16> to vector<8x512xbf16>
    %14 = arith.extf %13 : vector<8x512xbf16> to vector<8x512xf32>
    %c0_18 = arith.constant 0 : index
    %c2_19 = arith.constant 2 : index
    %c0_20 = arith.constant 0 : index
    %c0_21 = arith.constant 0 : index
    %15 = vector.load %arg3[%c0_18, %c2_19, %c0_20, %c0_21] : memref<1x3x8x512xbf16, #tpu.memory_space<vmem>>, vector<1x1x8x512xbf16>
    %16 = vector.shape_cast %15 : vector<1x1x8x512xbf16> to vector<8x512xbf16>
    %17 = arith.extf %16 : vector<8x512xbf16> to vector<8x512xf32>
    %c0_22 = arith.constant 0 : index
    %c0_23 = arith.constant 0 : index
    %c0_24 = arith.constant 0 : index
    %18 = vector.load %arg4[%c0_22, %c0_23, %c0_24] : memref<1x8x512xf32, #tpu.memory_space<vmem>>, vector<1x8x512xf32>
    %19 = vector.shape_cast %18 : vector<1x8x512xf32> to vector<8x512xf32>
    %20 = arith.subf %17, %14 : vector<8x512xf32>
    %21 = arith.subf %20, %11 : vector<8x512xf32>
    %cst = arith.constant 0.000000e+00 : f32
    %22 = vector.broadcast %cst : f32 to vector<8x512xf32>
    %23 = arith.maximumf %21, %22 : vector<8x512xf32>
    %24 = arith.subf %19, %23 : vector<8x512xf32>
    %cst_25 = arith.constant 0.000000e+00 : f32
    %25 = vector.broadcast %cst_25 : f32 to vector<8x512xf32>
    %26 = arith.maximumf %24, %25 : vector<8x512xf32>
    %cst_26 = arith.constant 5.000000e-01 : f32
    %27 = vector.broadcast %cst_26 : f32 to vector<8x512xf32>
    %28 = arith.cmpf ogt, %26, %27 : vector<8x512xf32>
    %cst_27 = arith.constant 0.000000e+00 : f32
    %29 = vector.broadcast %cst_27 : f32 to vector<8x512xf32>
    %30 = arith.cmpf ogt, %19, %29 : vector<8x512xf32>
    %cst_28 = arith.constant 0.000000e+00 : f32
    %31 = vector.broadcast %cst_28 : f32 to vector<8x512xf32>
    %32 = arith.maximumf %4, %31 : vector<8x512xf32>
    %33 = arith.mulf %4, %11 : vector<8x512xf32>
    %34 = arith.subf %32, %33 : vector<8x512xf32>
    %35 = math.absf %4 : vector<8x512xf32>
    %cst_29 = arith.constant 0.000000e+00 : f32
    %36 = vector.broadcast %cst_29 : f32 to vector<8x512xf32>
    %37 = arith.subf %36, %35 : vector<8x512xf32>
    %38 = math.exp %37 : vector<8x512xf32>
    %cst_30 = arith.constant 1.000000e+00 : f32
    %39 = vector.broadcast %cst_30 : f32 to vector<8x512xf32>
    %40 = arith.addf %39, %38 : vector<8x512xf32>
    %41 = math.log %40 : vector<8x512xf32>
    %42 = arith.addf %34, %41 : vector<8x512xf32>
    %cst_31 = arith.constant 0.000000e+00 : f32
    %43 = vector.broadcast %cst_31 : f32 to vector<8x512xf32>
    %44 = arith.maximumf %6, %43 : vector<8x512xf32>
    %45 = arith.mulf %6, %14 : vector<8x512xf32>
    %46 = arith.subf %44, %45 : vector<8x512xf32>
    %47 = math.absf %6 : vector<8x512xf32>
    %cst_32 = arith.constant 0.000000e+00 : f32
    %48 = vector.broadcast %cst_32 : f32 to vector<8x512xf32>
    %49 = arith.subf %48, %47 : vector<8x512xf32>
    %50 = math.exp %49 : vector<8x512xf32>
    %cst_33 = arith.constant 1.000000e+00 : f32
    %51 = vector.broadcast %cst_33 : f32 to vector<8x512xf32>
    %52 = arith.addf %51, %50 : vector<8x512xf32>
    %53 = math.log %52 : vector<8x512xf32>
    %54 = arith.addf %46, %53 : vector<8x512xf32>
    %55 = arith.addf %42, %54 : vector<8x512xf32>
    %cst_34 = arith.constant 0.000000e+00 : f32
    %56 = vector.broadcast %cst_34 : f32 to vector<8x512xf32>
    %57 = arith.select %28, %55, %56 : vector<8x512xi1>, vector<8x512xf32>
    %cst_35 = arith.constant 0.000000e+00 : f32
    %58 = vector.broadcast %cst_35 : f32 to vector<8x512xf32>
    %59 = arith.maximumf %8, %58 : vector<8x512xf32>
    %60 = arith.mulf %8, %17 : vector<8x512xf32>
    %61 = arith.subf %59, %60 : vector<8x512xf32>
    %62 = math.absf %8 : vector<8x512xf32>
    %cst_36 = arith.constant 0.000000e+00 : f32
    %63 = vector.broadcast %cst_36 : f32 to vector<8x512xf32>
    %64 = arith.subf %63, %62 : vector<8x512xf32>
    %65 = math.exp %64 : vector<8x512xf32>
    %cst_37 = arith.constant 1.000000e+00 : f32
    %66 = vector.broadcast %cst_37 : f32 to vector<8x512xf32>
    %67 = arith.addf %66, %65 : vector<8x512xf32>
    %68 = math.log %67 : vector<8x512xf32>
    %69 = arith.addf %61, %68 : vector<8x512xf32>
    %cst_38 = arith.constant 0.000000e+00 : f32
    %70 = vector.broadcast %cst_38 : f32 to vector<8x512xf32>
    %71 = arith.select %30, %69, %70 : vector<8x512xi1>, vector<8x512xf32>
    %c0_39 = arith.constant 0 : index
    %c0_40 = arith.constant 0 : index
    %c0_41 = arith.constant 0 : index
    %72 = vector.load %arg6[%c0_39, %c0_40, %c0_41] : memref<4x8x512xf32, #tpu.memory_space<vmem>>, vector<1x8x512xf32>
    %73 = vector.shape_cast %72 : vector<1x8x512xf32> to vector<8x512xf32>
    %74 = arith.addf %73, %57 : vector<8x512xf32>
    %c0_42 = arith.constant 0 : index
    %c0_43 = arith.constant 0 : index
    %c0_44 = arith.constant 0 : index
    %75 = vector.load %arg6[%c0_42, %c0_43, %c0_44] : memref<4x8x512xf32, #tpu.memory_space<vmem>>, vector<1x8x512xf32>
    %76 = vector.shape_cast %75 : vector<1x8x512xf32> to vector<8x512xf32>
    %77 = vector.shape_cast %74 : vector<8x512xf32> to vector<1x8x512xf32>
    tpu.vector_store %arg6[%c0_42, %c0_43, %c0_44], %77 {strides = array<i32>} : memref<4x8x512xf32, #tpu.memory_space<vmem>>, vector<1x8x512xf32>,
    %c1_45 = arith.constant 1 : index
    %c0_46 = arith.constant 0 : index
    %c0_47 = arith.constant 0 : index
    %78 = vector.load %arg6[%c1_45, %c0_46, %c0_47] : memref<4x8x512xf32, #tpu.memory_space<vmem>>, vector<1x8x512xf32>
    %79 = vector.shape_cast %78 : vector<1x8x512xf32> to vector<8x512xf32>
    %80 = arith.addf %79, %71 : vector<8x512xf32>
    %c1_48 = arith.constant 1 : index
    %c0_49 = arith.constant 0 : index
    %c0_50 = arith.constant 0 : index
    %81 = vector.load %arg6[%c1_48, %c0_49, %c0_50] : memref<4x8x512xf32, #tpu.memory_space<vmem>>, vector<1x8x512xf32>
    %82 = vector.shape_cast %81 : vector<1x8x512xf32> to vector<8x512xf32>
    %83 = vector.shape_cast %80 : vector<8x512xf32> to vector<1x8x512xf32>
    tpu.vector_store %arg6[%c1_48, %c0_49, %c0_50], %83 {strides = array<i32>} : memref<4x8x512xf32, #tpu.memory_space<vmem>>, vector<1x8x512xf32>,
    %c2_51 = arith.constant 2 : index
    %c0_52 = arith.constant 0 : index
    %c0_53 = arith.constant 0 : index
    %84 = vector.load %arg6[%c2_51, %c0_52, %c0_53] : memref<4x8x512xf32, #tpu.memory_space<vmem>>, vector<1x8x512xf32>
    %85 = vector.shape_cast %84 : vector<1x8x512xf32> to vector<8x512xf32>
    %86 = arith.extui %28 : vector<8x512xi1> to vector<8x512xi32>
    %87 = arith.sitofp %86 : vector<8x512xi32> to vector<8x512xf32>
    %88 = arith.addf %85, %87 : vector<8x512xf32>
    %c2_54 = arith.constant 2 : index
    %c0_55 = arith.constant 0 : index
    %c0_56 = arith.constant 0 : index
    %89 = vector.load %arg6[%c2_54, %c0_55, %c0_56] : memref<4x8x512xf32, #tpu.memory_space<vmem>>, vector<1x8x512xf32>
    %90 = vector.shape_cast %89 : vector<1x8x512xf32> to vector<8x512xf32>
    %91 = vector.shape_cast %88 : vector<8x512xf32> to vector<1x8x512xf32>
    tpu.vector_store %arg6[%c2_54, %c0_55, %c0_56], %91 {strides = array<i32>} : memref<4x8x512xf32, #tpu.memory_space<vmem>>, vector<1x8x512xf32>,
    %c3 = arith.constant 3 : index
    %c0_57 = arith.constant 0 : index
    %c0_58 = arith.constant 0 : index
    %92 = vector.load %arg6[%c3, %c0_57, %c0_58] : memref<4x8x512xf32, #tpu.memory_space<vmem>>, vector<1x8x512xf32>
    %93 = vector.shape_cast %92 : vector<1x8x512xf32> to vector<8x512xf32>
    %94 = arith.extui %30 : vector<8x512xi1> to vector<8x512xi32>
    %95 = arith.sitofp %94 : vector<8x512xi32> to vector<8x512xf32>
    %96 = arith.addf %93, %95 : vector<8x512xf32>
    %c3_59 = arith.constant 3 : index
    %c0_60 = arith.constant 0 : index
    %c0_61 = arith.constant 0 : index
    %97 = vector.load %arg6[%c3_59, %c0_60, %c0_61] : memref<4x8x512xf32, #tpu.memory_space<vmem>>, vector<1x8x512xf32>
    %98 = vector.shape_cast %97 : vector<1x8x512xf32> to vector<8x512xf32>
    %99 = vector.shape_cast %96 : vector<8x512xf32> to vector<1x8x512xf32>
    tpu.vector_store %arg6[%c3_59, %c0_60, %c0_61], %99 {strides = array<i32>} : memref<4x8x512xf32, #tpu.memory_space<vmem>>, vector<1x8x512xf32>,
    %c0_i32_62 = arith.constant 0 : i32
    %100 = arith.cmpi eq, %arg1, %c0_i32_62 : i32
    %101 = arith.extui %100 : i1 to i32
    %c0_i32_63 = arith.constant 0 : i32
    %102 = arith.cmpi ne, %101, %c0_i32_63 : i32
    scf.if %102 {
      %c0_64 = arith.constant 0 : index
      %c0_65 = arith.constant 0 : index
      %c0_66 = arith.constant 0 : index
      %103 = vector.load %arg6[%c0_64, %c0_65, %c0_66] : memref<4x8x512xf32, #tpu.memory_space<vmem>>, vector<4x8x512xf32>
      %cst_67 = arith.constant dense<0.000000e+00> : vector<4x512xf32>
      %104 = vector.multi_reduction <add>, %103, %cst_67 [1] : vector<4x8x512xf32> to vector<4x512xf32>
      %c0_68 = arith.constant 0 : index
      %c0_69 = arith.constant 0 : index
      %c0_70 = arith.constant 0 : index
      %105 = vector.load %arg5[%c0_68, %c0_69, %c0_70] : memref<1x4x512xf32, #tpu.memory_space<vmem>>, vector<1x4x512xf32>
      %106 = vector.shape_cast %105 : vector<1x4x512xf32> to vector<4x512xf32>
      %107 = vector.shape_cast %104 : vector<4x512xf32> to vector<1x4x512xf32>
      tpu.vector_store %arg5[%c0_68, %c0_69, %c0_70], %107 {strides = array<i32>} : memref<1x4x512xf32, #tpu.memory_space<vmem>>, vector<1x4x512xf32>,
    } else {
    }
    return
  }
  func.func @transform_0(%arg0: i32, %arg1: i32) -> (i32, i32, i32, i32) {
    %c0_i32 = arith.constant 0 : i32
    %c0_i32_0 = arith.constant 0 : i32
    %c0_i32_1 = arith.constant 0 : i32
    return %arg0, %c0_i32, %arg1, %c0_i32_0 : i32, i32, i32, i32
  }
  func.func @transform_1(%arg0: i32, %arg1: i32) -> (i32, i32, i32, i32) {
    %c0_i32 = arith.constant 0 : i32
    %c0_i32_0 = arith.constant 0 : i32
    %c0_i32_1 = arith.constant 0 : i32
    return %arg0, %c0_i32, %arg1, %c0_i32_0 : i32, i32, i32, i32
  }
  func.func @transform_2(%arg0: i32, %arg1: i32) -> (i32, i32, i32) {
    %c0_i32 = arith.constant 0 : i32
    %c0_i32_0 = arith.constant 0 : i32
    return %arg0, %arg1, %c0_i32 : i32, i32, i32
  }
  func.func @transform_3(%arg0: i32, %arg1: i32) -> (i32, i32, i32) {
    %c0_i32 = arith.constant 0 : i32
    %c0_i32_0 = arith.constant 0 : i32
    %c0_i32_1 = arith.constant 0 : i32
    return %arg0, %c0_i32, %c0_i32_0 : i32, i32, i32
  }
}

</mosaic_0001>

<bundles_post_ra>
// kernel: tpu_custom_call.1
= control target key start
LH: loop header
LB: loop body
LE: loop exit
PB: predicated region body
PF: predicated region fallthrough
CT: control target
= control target key end

     0   :  { %s1748_s0 = inlined_call_operand.hbm [shape: f32[2,3,8,512], index: 0, kind: input, shape index: {}]   ;;  %s1749_s1 = inlined_call_operand.hbm [shape: bf16[2,3,8,512], index: 1, kind: input, shape index: {}]   ;;  %s1750_s2 = inlined_call_operand.hbm [shape: f32[2,8,512], index: 2, kind: input, shape index: {}]   ;;  %s1751_s3 = inlined_call_operand.hbm [shape: f32[2,4,512], index: 3, kind: output, shape index: {}]  }
   0x1   :  { %1760 = sst [smem:[#allocation18_spill]] %s1748_s0 }
   0x2   :  { %1761 = sst [smem:[#allocation19_spill]] %s1749_s1 }
   0x3   :  { %8 = vsyncpa [#allocation4], 0 }
   0x4   :  { %10 = vsyncpa [#allocation4 + $0x1], 0 }
   0x5   :  { %11 = vsyncpa [#allocation7], 0 }
   0x6   :  { %13 = vsyncpa [#allocation7 + $0x1], 0 }
   0x7   :  { %14 = vsyncpa [#allocation5], 0 }
   0x8   :  { %16 = vsyncpa [#allocation5 + $0x1], 0  ;;  %s1274_s12 = smov 0   ;;  %s1276_s13 = smov 0  }
   0x9   :  { %s1278_s14 = smov 0   ;;  %s1280_s15 = smov 0  }
   0xa   :  { %s1282_s16 = smov 0   ;;  %s1284_s17 = smov 0  }
   0xb LB: > { %1762 = sst [smem:[#allocation13_spill]] %s1231_s14  ;;  %s1305_s18 = sadd.s32 4294967295, %s1243_s17   ;;  %s1243_s17 = sphi %s1284_s17, %s22_s17   ;;  %s1239_s16 = sphi %s1282_s16, %s1799_s16   ;;  %s1235_s15 = sphi %s1280_s15, %s1798_s15   ;;  %s1231_s14 = sphi %s1278_s14, %s1794_s14   ;;  %s1227_s13 = sphi %s1276_s13, %s1797_s13   ;;  %s1223_s12 = sphi %s1274_s12, %s1796_s12  }
   0xc   : > { %1763 = sst [smem:[#allocation14_spill]] %s1243_s17  ;;  %s898_s19 = sadd.s32 4294967294, %s1243_s17  }
   0xd   : > { %s34_s20 = sadd.s32 1, %s1239_s16  ;;  %s43_s21 = sadd.s32 1, %s1231_s14 }
   0xe   : > { %p36_p0 = scmp.ge.s32.totalorder %s34_s20, 2  ;;  %p50_p1 = scmp.ne.s32.totalorder %s1231_s14, %s1227_s13 }
   0xf   : > { %p51_p2 = scmp.eq.s32.totalorder %s1243_s17, 0  ;;  %p56_p3 = scmp.ne.s32.totalorder %s1227_s13, %s1223_s12 }
  0x10   : > { %s1801_s20 = smov (%p36_p0, %s34_s20), 0  ;;  %p57_p5 = scmp.eq.s32.totalorder %s1305_s18, 0 }
  0x11   : > { %1764 = sst [smem:[#allocation15_spill]] %s1801_s20  ;;  %p1317_p4 = por %p51_p2, %p50_p1 }
  0x12   : > { %s38_s23 = ssub.s32 %s1239_s16, %s1801_s20  ;;  %p136_p6 = scmp.eq.s32.totalorder %s1305_s18, 1 }
  0x13   : > { %p41_p7 = scmp.eq.s32.totalorder %s38_s23, 0  ;;  %p1325_p8 = por %p57_p5, %p56_p3 }
  0x14   : > { %p1329_p9 = por %p136_p6, %p50_p1  ;;  %p142_p10 = scmp.eq.s32.totalorder %s898_s19, 1 }
  0x15   : > { %s1766_s24 = scalar_select %p1325_p8, 1, 0 }
  0x16   : > { %s1767_s25 = scalar_select %p1329_p9, 1, 0 }
  0x17   : > { %s1334_s26 = scalar_select %p41_p7, %s1231_s14, %s43_s21  }
  0x18   : > { %p1336_p11 = por %p142_p10, %p56_p3  ;;  %p964_p13 = scmp.lt.s32.totalorder %s1243_s17, 2 }
  0x19   : > { %1768 = sst [smem:[#allocation16_spill]] %s1334_s26  ;;  %s1343_s28 = sand.u32 1, %s1231_s14  }
  0x1a   : > { %s1769_s27 = scalar_select %p1336_p11, 1, 0 }
  0x1b   : > { %s185_s29 = sand.u32 1, %s1243_s17   ;;  %s938_s30 = smul.u32 48, %s1343_s28 }
  0x1c   : > { %1770 = sst [smem:[#allocation17_spill]] %s1769_s27  ;;  %p1349_p0 = pnand %p964_p13, %p1317_p4 }
  0x1d   : > { %s939_s5 = smul.u32 768, %s1239_s16  ;;  %s189_s6 = scalar_lea.vmem [#allocation6], %s938_s30 }
  0x1e   : > { %s1771_s4 = scalar_select %p1349_p0, 1, 0 }
  0x1f   : > { %s198_s7 = sshll.u32 %s189_s6, 4  ;;  %s1772_s1 = sld [smem:[#allocation19_spill]]  ;;  %s1359_s7 = int_to_ptr.vmem [resolvable:$true] %s198_s7 }
  0x20   : > { %s1361_s11 = scalar_lea.sflag [#allocation7], %s185_s29  ;;  %p1367_p2 = pneg %p1349_p0 }
  0x25   : > { %s1357_s10 = scalar_lea.hbm %s1772_s1, %s939_s5  ;;  %s1072_s30 = scalar_lea.hbm %s1772_s1, 1536 }
  0x26   : > { %s1067_s19 = scalar_lea.hbm %s1357_s10, 768  ;;  %p1073_p5 = scmp.lt.u32.totalorder %s1357_s10, %s1772_s1 }
  0x27   : > { %p1068_p1 = scmp.ne.s32.totalorder %s1357_s10, %s1067_s19  ;;  %p1074_p6 = scmp.lt.u32.totalorder %s1072_s30, %s1067_s19 }
  0x28   : > { %p1076_p10 = scmp.lt.u32.totalorder %s1067_s19, %s1357_s10 }
  0x29   : > { %p1070_p3 = pnand %p1367_p2, %p1068_p1  ;;  %p1075_p7 = por %p1074_p6, %p1073_p5 }
  0x2b   : > { %p1071_p4 = pneg %p1070_p3  ;;  %p1077_p13 = por %p1076_p10, %p1075_p7 }
  0x2d   : > { %p1078_p12 = pnand %p1077_p13, %p1071_p4 }
  0x2f   : > { %1081 = shalt.err (!%p1078_p12)
}
  0x30   : > { %s1082_s29 = scalar_lea.vmem %s1359_s7, 768  ;;  %s1245_s8 = smov [#allocation6]  }
  0x31   : > { %p1083_p1 = scmp.ne.s32.totalorder %s1359_s7, %s1082_s29  ;;  %s1087_s9 = sshll.u32 %s1245_s8, 4  ;;  %s1088_s9 = int_to_ptr.vmem [resolvable:$false] %s1087_s9 }
  0x32   : > { %s1089_s22 = scalar_lea.vmem %s1088_s9, 1536  ;;  %p1090_p9 = scmp.lt.s32.totalorder %s1359_s7, %s1088_s9 }
  0x33   : > { %p1085_p3 = pnand %p1083_p1, %p1367_p2  ;;  %p1091_p8 = scmp.lt.s32.totalorder %s1089_s22, %s1082_s29 }
  0x35   : > { %p1086_p11 = pneg %p1085_p3  ;;  %p1092_p5 = por %p1091_p8, %p1090_p9 }
  0x37   : > { %p1093_p6 = pnand %p1092_p5, %p1086_p11 }
  0x39   : > { %1096 = shalt.err (!%p1093_p6)
}
  0x3a   : > { %s1246_s19 = smov 256   ;;  %s1247_s23 = smov 16  }
  0x3b   : > { %956 = dma.hbm_to_vmem [thread:$0]  (!%p1349_p0), %s1357_s10, 768, %s1359_s7, %s1361_s11, %s1246_s19, %s1246_s19, %s1247_s23  }
  0x3c   : > { %p906_p12 = scmp.ge.s32.totalorder %s1243_s17, 1  ;;  %p227_p4 = scmp.lt.s32.totalorder %s1243_s17, 3 }
  0x3d   : > { %s936_s5 = smul.u32 96, %s1343_s28  ;;  %s1775_s0 = sld [smem:[#allocation18_spill]] }
  0x3e   : > { %p1393_p8 = pnand %p906_p12, %p227_p4  ;;  %s937_s6 = smul.u32 1536, %s1239_s16 }
  0x3f   : > { %s166_s1 = scalar_lea.vmem [#allocation3], %s936_s5  ;;  %s163_s10 = scalar_lea.sflag [#allocation4], %s1343_s28 }
  0x40   : > { %s1774_s30 = scalar_select %p1393_p8, 1, 0 }
  0x41   : > { %s175_s7 = sshll.u32 %s166_s1, 4  ;;  %s1405_s7 = int_to_ptr.vmem [resolvable:$true] %s175_s7 }
  0x43   : > { %s1403_s22 = scalar_lea.hbm %s1775_s0, %s937_s6  ;;  %s1102_s8 = scalar_lea.hbm %s1775_s0, 3072 }
  0x44   : > { %s1097_s19 = scalar_lea.hbm %s1403_s22, 1536  ;;  %p1103_p10 = scmp.lt.u32.totalorder %s1403_s22, %s1775_s0 }
  0x45   : > { %p1098_p9 = scmp.ne.s32.totalorder %s1403_s22, %s1097_s19  ;;  %p1104_p13 = scmp.lt.u32.totalorder %s1102_s8, %s1097_s19 }
  0x46   : > { %p1106_p3 = scmp.lt.u32.totalorder %s1097_s19, %s1403_s22 }
  0x47   : > { %p1100_p11 = pnand %p1098_p9, %p1367_p2  ;;  %p1105_p1 = por %p1104_p13, %p1103_p10 }
  0x49   : > { %p1101_p7 = pneg %p1100_p11  ;;  %p1107_p5 = por %p1106_p3, %p1105_p1 }
  0x4b   : > { %p1108_p6 = pnand %p1107_p5, %p1101_p7 }
  0x4d   : > { %1111 = shalt.err (!%p1108_p6)
}
  0x4e   : > { %s1112_s1 = scalar_lea.vmem %s1405_s7, 1536  ;;  %s1248_s5 = smov [#allocation3]  }
  0x4f   : > { %p1113_p12 = scmp.ne.s32.totalorder %s1405_s7, %s1112_s1  ;;  %s1117_s29 = sshll.u32 %s1248_s5, 4  ;;  %s1118_s29 = int_to_ptr.vmem [resolvable:$false] %s1117_s29 }
  0x50   : > { %s1119_s23 = scalar_lea.vmem %s1118_s29, 3072  ;;  %p1120_p11 = scmp.lt.s32.totalorder %s1405_s7, %s1118_s29 }
  0x51   : > { %p1115_p4 = pnand %p1113_p12, %p1367_p2  ;;  %p1121_p8 = scmp.lt.s32.totalorder %s1119_s23, %s1112_s1 }
  0x53   : > { %p1116_p9 = pneg %p1115_p4  ;;  %p1122_p10 = por %p1121_p8, %p1120_p11 }
  0x55   : > { %p1123_p13 = pnand %p1122_p10, %p1116_p9 }
  0x57   : > { %1126 = shalt.err (!%p1123_p13)
}
  0x58   : > { %s1249_s19 = smov 512   ;;  %s1250_s8 = smov 32  }
  0x59   : > { %953 = dma.hbm_to_vmem [thread:$0]  (!%p1349_p0), %s1403_s22, 1536, %s1405_s7, %s163_s10, %s1249_s19, %s1249_s19, %s1250_s8  }
  0x5a   : > { %s934_s6 = sshll.u32 %s1239_s16, 9  ;;  %s1776_s9 = sshll.u32 %s1343_s28, 5 }
  0x5b   : > { %s212_s5 = scalar_lea.vmem [#allocation8], %s1776_s9  ;;  %s220_s0 = scalar_lea.hbm %s1750_s2, %s934_s6 }
  0x5c   : > { %s222_s29 = sshll.u32 %s212_s5, 4  ;;  %s1127_s20 = scalar_lea.hbm %s220_s0, 512  ;;  %s223_s29 = int_to_ptr.vmem [resolvable:$true] %s222_s29 }
  0x5d   : > { %p1128_p8 = scmp.ne.s32.totalorder %s220_s0, %s1127_s20  ;;  %s1132_s17 = scalar_lea.hbm %s1750_s2, 1024 }
  0x5e   : > { %p1133_p3 = scmp.lt.u32.totalorder %s220_s0, %s1750_s2  ;;  %p1134_p5 = scmp.lt.u32.totalorder %s1132_s17, %s1127_s20 }
  0x5f   : > { %p1130_p7 = pnand %p1128_p8, %p1367_p2  ;;  %p1136_p12 = scmp.lt.u32.totalorder %s1127_s20, %s220_s0 }
  0x60   : > { %p1135_p6 = por %p1134_p5, %p1133_p3 }
  0x61   : > { %p1131_p1 = pneg %p1130_p7 }
  0x62   : > { %p1137_p4 = por %p1136_p12, %p1135_p6 }
  0x64   : > { %p1138_p9 = pnand %p1137_p4, %p1131_p1 }
  0x66   : > { %1141 = shalt.err (!%p1138_p9)
}
  0x67   : > { %s1142_s28 = scalar_lea.vmem %s223_s29, 512  ;;  %s1251_s7 = smov [#allocation8]  }
  0x68   : > { %p1143_p11 = scmp.ne.s32.totalorder %s223_s29, %s1142_s28  ;;  %s1147_s10 = sshll.u32 %s1251_s7, 4  ;;  %s1148_s10 = int_to_ptr.vmem [resolvable:$false] %s1147_s10 }
  0x69   : > { %s1149_s14 = scalar_lea.vmem %s1148_s10, 1024  ;;  %p1150_p8 = scmp.lt.s32.totalorder %s223_s29, %s1148_s10 }
  0x6a   : > { %p1145_p10 = pnand %p1143_p11, %p1367_p2  ;;  %p1151_p7 = scmp.lt.s32.totalorder %s1149_s14, %s1142_s28 }
  0x6c   : > { %p1146_p13 = pneg %p1145_p10  ;;  %p1152_p0 = por %p1151_p7, %p1150_p8 }
  0x6e   : > { %p1153_p3 = pnand %p1152_p0, %p1146_p13 }
  0x70   : > { %1156 = shalt.err (!%p1153_p3)
}
  0x71   : > { %p1777_p5 = scmp.ne.s32.totalorder %s1771_s4, 0  ;;  %p1778_p1 = scmp.ne.s32.totalorder %s1774_s30, 0 }
  0x72   : > { %s1453_s17 = sand.u32 (!%p1778_p1), 1, %s1227_s13   ;;  %p1779_p2 = scmp.ne.s32.totalorder (!%p1778_p1), %s1766_s24, 0 }
  0x73   : > { %959 = dma.hbm_to_vmem [thread:$0]  (!%p1777_p5), %s220_s0, 512, %s223_s29, %s1361_s11  }
  0x74   : > { %231 = sbr.rel (%p1778_p1) target bundleno = 228 (0xe4), region = 32  ;;  %s234_s26 = scalar_lea.sflag (!%p1778_p1), [#allocation4], %s1453_s17 }
  0x75   : > { %s940_s20 = smul.u32 (!%p1778_p1), 96, %s1453_s17 }
  0x77   : > { %s1457_s27 = scalar_lea.vmem (!%p1778_p1), [#allocation3], %s940_s20 }
  0x7b   : > { %1210 = dma.done.wait (%p1779_p2), %s234_s26, 1536  }
  0x7c   : > { %1212 = vsyncadd (%p1779_p2), %s234_s26, 4294965760  ;;  %s242_s0 = sand.u32 1, %s1305_s18   ;;  %s941_s4 = smul.u32 48, %s1453_s17 }
  0x7d   : > { %s243_s11 = scalar_lea.sflag [#allocation7], %s242_s0 }
  0x7e   : > { %s246_s21 = scalar_lea.vmem [#allocation6], %s941_s4 }
  0x7f   : > { %1214 = dma.done.wait (%p1779_p2), %s243_s11, 1280  }
  0x80   : > { %1216 = vsyncadd (%p1779_p2), %s243_s11, 4294966016  ;;  %v1470_v0 = vld [vmem:[%s1457_s27] sm:$0xff]  ;;  %v323_v2 = vld [vmem:[%s246_s21 + $0x8] sm:$0xff]  ;;  %s907_s18 = sshll.u32 %s1453_s17, 5  ;;  %s908_s30 = sshll.u32 %s1453_s17, 4  ;;  %vm725_vm8 = vcmask 1041409  }
  0x81   : > { %v322_v1 = vld [vmem:[%s246_s21] sm:$0xff]  ;;  %v1472_v3 = vld [vmem:[%s246_s21 + $0x10] sm:$0xff]  ;;  %v386_v4 = vand.u32 2147483647, %v1470_v0  ;;  %v326_v7 = vunpack.c.l.bf16 %v323_v2  ;;  %v327_v8 = vunpack.c.h.bf16 %v323_v2  ;;  %v1475_v9 = vld [vmem:[%s246_s21 + $0x18] sm:$0xff]  ;;  %v374_v22 = vmax.f32 %v1470_v0, 0.0 }
  0x82   : > { %v324_v5 = vunpack.c.l.bf16 %v322_v1  ;;  %v325_v6 = vunpack.c.h.bf16 %v322_v1  ;;  %v1477_v10 = vld [vmem:[%s246_s21 + $0x20] sm:$0xff]  ;;  %v1479_v11 = vld [vmem:[%s246_s21 + $0x28] sm:$0xff]  ;;  %v331_v12 = vunpack.c.l.bf16 %v1472_v3  ;;  %v332_v13 = vunpack.c.h.bf16 %v1472_v3  ;;  %s255_s24 = scalar_lea.vmem [#allocation8], %s907_s18  ;;  %s935_s19 = sshll.u32 %s1235_s15, 8 }
  0x83   : > { %v333_v14 = vunpack.c.l.bf16 %v1475_v9  ;;  %v334_v15 = vunpack.c.h.bf16 %v1475_v9  ;;  %v309_v16 = vld [vmem:[%s1457_s27 + $0x8] sm:$0xff]  ;;  %v310_v17 = vld [vmem:[%s1457_s27 + $0x10] sm:$0xff]  ;;  %v338_v18 = vunpack.c.l.bf16 %v1477_v10  ;;  %v339_v19 = vunpack.c.h.bf16 %v1477_v10  ;;  %v311_v32 = vld [vmem:[%s1457_s27 + $0x18] sm:$0xff]  ;;  %s287_s8 = scalar_lea.vmem [#allocation9], %s908_s30  ;;  %s1698_s29 = scalar_lea.hbm %s1751_s3, %s935_s19 }
  0x84   : > { %v340_v20 = vunpack.c.l.bf16 %v1479_v11  ;;  %v341_v21 = vunpack.c.h.bf16 %v1479_v11  ;;  %v375_v23 = vmax.f32 %v309_v16, 0.0  ;;  %v376_v28 = vmax.f32 %v310_v17, 0.0  ;;  %v1510_v37 = vld [vmem:[%s255_s24] sm:$0xff]  ;;  %v1512_v38 = vld [vmem:[%s255_s24 + $0x8] sm:$0xff]  ;;  %v1514_v39 = vld [vmem:[%s255_s24 + $0x10] sm:$0xff]  ;;  %s767_s6 = sshll.u32 %s287_s8, 4  ;;  %s1700_s6 = int_to_ptr.vmem [resolvable:$true] %s767_s6 }
  0x85   : > { %v346_v24 = vsub.f32 %v338_v18, %v331_v12  ;;  %v347_v25 = vsub.f32 %v339_v19, %v332_v13  ;;  %v387_v29 = vand.u32 2147483647, %v309_v16  ;;  %v388_v30 = vand.u32 2147483647, %v310_v17  ;;  %v1517_v44 = vld [vmem:[%s255_s24 + $0x18] sm:$0xff]  ;;  %v909_v60 = vld [vmem:[%s1457_s27 + $0x20] sm:$0xff] }
  0x86   : > { %v348_v26 = vsub.f32 %v340_v20, %v333_v14  ;;  %v349_v27 = vsub.f32 %v341_v21, %v334_v15  ;;  %v390_v31 = vsub.f32 0.0, %v386_v4  ;;  %v377_v40 = vmax.f32 %v311_v32, 0.0  ;;  %v911_v1 = vld [vmem:[%s1457_s27 + $0x30] sm:$0xff]  ;;  %s753_s15 = scalar_lea.sflag [#allocation5], %s1453_s17  ;;  %s1157_s1 = scalar_lea.vmem %s1700_s6, 256 }
  0x87   : > { %v350_v33 = vsub.f32 %v346_v24, %v324_v5  ;;  %v351_v34 = vsub.f32 %v347_v25, %v325_v6  ;;  %v378_v41 = vmul.f32 %v324_v5, %v1470_v0  ;;  %v379_v42 = vmul.f32 %v325_v6, %v309_v16  ;;  %v910_v0 = vld [vmem:[%s1457_s27 + $0x28] sm:$0xff]  ;;  %p1158_p0 = scmp.ne.s32.totalorder %s1700_s6, %s1157_s1  ;;  %p1788_p6 = scmp.ne.s32.totalorder %s1767_s25, 0 }
  0x88   : > { %v352_v35 = vsub.f32 %v348_v26, %v326_v7  ;;  %v353_v36 = vsub.f32 %v349_v27, %v327_v8  ;;  %v380_v43 = vmul.f32 %v326_v7, %v310_v17  ;;  %v389_v49 = vand.u32 2147483647, %v311_v32  ;;  %v912_v7 = vld [vmem:[%s1457_s27 + $0x38] sm:$0xff]  ;;  %s1253_s23 = smov [#allocation9]  }
  0x89   : > { %v354_v45 = vmax.f32 %v350_v33, 0.0  ;;  %v355_v46 = vmax.f32 %v351_v34, 0.0  ;;  %v391_v50 = vsub.f32 0.0, %v387_v29  ;;  %v392_v51 = vsub.f32 0.0, %v388_v30  ;;  %p1159_p12 = pnand %p1158_p0, %p1788_p6  ;;  %s1161_s22 = sshll.u32 %s1253_s23, 4  ;;  %s1162_s22 = int_to_ptr.vmem [resolvable:$false] %s1161_s22 }
  0x8a   : > { %v356_v47 = vmax.f32 %v352_v35, 0.0  ;;  %v357_v48 = vmax.f32 %v353_v36, 0.0  ;;  %v394_v52 = vmul.f32 1.442695, %v390_v31  ;;  %v381_v56 = vmul.f32 %v327_v8, %v311_v32  ;;  %s1163_s28 = scalar_lea.vmem %s1162_s22, 512  ;;  %p1164_p9 = scmp.lt.s32.totalorder %s1700_s6, %s1162_s22 }
  0x8b   : > { %v358_v53 = vsub.f32 %v1510_v37, %v354_v45  ;;  %v359_v54 = vsub.f32 %v1512_v38, %v355_v46  ;;  %v393_v57 = vsub.f32 0.0, %v389_v49  ;;  %v396_v58 = vmul.f32 1.442695, %v391_v50  ;;  %v1563_v45 = vld [vmem:[%s1457_s27 + $0x48] sm:$0xff]  ;;  %v1566_v46 = vld [vmem:[%s1457_s27 + $0x50] sm:$0xff]  ;;  %p1160_p4 = pneg %p1159_p12  ;;  %p1165_p11 = scmp.lt.s32.totalorder %s1163_s28, %s1157_s1 }
  0x8c   : > { %v360_v55 = vsub.f32 %v1514_v39, %v356_v47  ;;  %1019 = vpow2.f32 %v394_v52  ;;  %v398_v59 = vmul.f32 1.442695, %v392_v51  ;;  %v361_v61 = vsub.f32 %v1517_v44, %v357_v48  ;;  %v1573_v51 = vld [vmem:[%s1457_s27 + $0x58] sm:$0xff] }
  0x8d   : > { %1021 = vpow2.f32 %v396_v58  ;;  %v400_v62 = vmul.f32 1.442695, %v393_v57  ;;  %v418_v63 = vmax.f32 %v909_v60, 0.0  ;;  %v1526_v2 = vsub.f32 %v374_v22, %v378_v41  ;;  %p1166_p10 = por %p1165_p11, %p1164_p9 }
  0x8e   : > { %v1528_v4 = vsub.f32 %v375_v23, %v379_v42  ;;  %v1530_v5 = vsub.f32 %v376_v28, %v380_v43  ;;  %v1532_v6 = vsub.f32 %v377_v40, %v381_v56  ;;  %v362_v8 = vmax.f32 %v358_v53, 0.0  ;;  %v1544_v40 = vld [vmem:[%s1457_s27 + $0x40] sm:$0xff] }
  0x8f   : > { %v363_v16 = vmax.f32 %v359_v54, 0.0  ;;  %v364_v17 = vmax.f32 %v360_v55, 0.0  ;;  %1023 = vpow2.f32 %v398_v59  ;;  %v365_v24 = vmax.f32 %v361_v61, 0.0  ;;  %p1167_p13 = pnand %p1166_p10, %p1160_p4 }
  0x90   : > { %1025 = vpow2.f32 %v400_v62  ;;  %v419_v25 = vmax.f32 %v910_v0, 0.0  ;;  %v430_v26 = vand.u32 2147483647, %v909_v60  ;;  %v420_v27 = vmax.f32 %v911_v1, 0.0 }
  0x91   : > { %v421_v29 = vmax.f32 %v912_v7, 0.0  ;;  %v431_v22 = vand.u32 2147483647, %v910_v0  ;;  %v432_v30 = vand.u32 2147483647, %v911_v1  ;;  %v422_v23 = vmul.f32 %v909_v60, %v331_v12 }
  0x92   : > { %v423_v28 = vmul.f32 %v910_v0, %v332_v13  ;;  %v433_v31 = vand.u32 2147483647, %v912_v7  ;;  %v434_v32 = vsub.f32 0.0, %v430_v26  ;;  %v424_v33 = vmul.f32 %v911_v1, %v333_v14 }
  0x93   : > { %v425_v34 = vmul.f32 %v912_v7, %v334_v15  ;;  %v435_v35 = vsub.f32 0.0, %v431_v22  ;;  %v436_v36 = vsub.f32 0.0, %v432_v30  ;;  %vm1546_vm0 = vcmp.gt.f32.partialorder %v362_v8, 0.5 }
  0x94   : > { %vm1550_vm1 = vcmp.gt.f32.partialorder %v363_v16, 0.5  ;;  %v437_v12 = vsub.f32 0.0, %v433_v31  ;;  %v438_v13 = vmul.f32 1.442695, %v434_v32  ;;  %vm1554_vm2 = vcmp.gt.f32.partialorder %v364_v17, 0.5 }
  0x95   : > { %vm1558_vm3 = vcmp.gt.f32.partialorder %v365_v24, 0.5  ;;  %v440_v15 = vmul.f32 1.442695, %v435_v35  ;;  %v442_v43 = vmul.f32 1.442695, %v436_v36  ;;  %v1568_v48 = vsub.f32 %v418_v63, %v422_v23 }
  0x96   : > { %v1020_v42 = vpop.eup %1019  ;;  %v1570_v49 = vsub.f32 %v419_v25, %v423_v28  ;;  %1027 = vpow2.f32 %v438_v13  ;;  %v1575_v52 = vsub.f32 %v420_v27, %v424_v33  ;;  %v1577_v53 = vsub.f32 %v421_v29, %v425_v34 }
  0x97   : > { %v402_v47 = vadd.f32 1.0, %v1020_v42  ;;  %v1022_v50 = vpop.eup %1021  ;;  %1029 = vpow2.f32 %v440_v15  ;;  %v444_v54 = vmul.f32 1.442695, %v437_v12  ;;  %v470_v56 = vmax.f32 %v1544_v40, 0.0 }
  0x98   : > { %v403_v55 = vadd.f32 1.0, %v1022_v50  ;;  %v482_v57 = vand.u32 2147483647, %v1544_v40  ;;  %v471_v59 = vmax.f32 %v1563_v45, 0.0  ;;  %v483_v60 = vand.u32 2147483647, %v1563_v45 }
  0x99   : > { %1031 = vlog2.f32 %v402_v47  ;;  %v1024_v58 = vpop.eup %1023  ;;  %v484_v61 = vand.u32 2147483647, %v1566_v46  ;;  %v485_v0 = vand.u32 2147483647, %v1573_v51  ;;  %vm370_vm4 = vcmp.gt.f32.partialorder %v1510_v37, 0.0 }
  0x9a   : > { %1033 = vpow2.f32 %v442_v43  ;;  %v1026_v62 = vpop.eup %1025  ;;  %v404_v63 = vadd.f32 1.0, %v1024_v58  ;;  %v486_v1 = vsub.f32 0.0, %v482_v57  ;;  %v487_v8 = vsub.f32 0.0, %v483_v60 }
  0x9b   : > { %1035 = vlog2.f32 %v403_v55  ;;  %v405_v7 = vadd.f32 1.0, %v1026_v62  ;;  %v488_v16 = vsub.f32 0.0, %v484_v61  ;;  %v489_v17 = vsub.f32 0.0, %v485_v0 }
  0x9c   : > { %1037 = vpow2.f32 %v444_v54  ;;  %v490_v24 = vmul.f32 1.442695, %v486_v1  ;;  %v1252_v25 = vmov 0.0   ;;  %v492_v27 = vmul.f32 1.442695, %v487_v8 }
  0x9d   : > { %1039 = vlog2.f32 %v404_v63  ;;  %v921_v26 = vsel %vm1546_vm0, 1.0, %v1252_v25  ;;  %v494_v29 = vmul.f32 1.442695, %v488_v16  ;;  %v922_v22 = vsel %vm1550_vm1, 1.0, %v1252_v25 }
  0x9e   : > { %1041 = vlog2.f32 %v405_v7  ;;  %v496_v30 = vmul.f32 1.442695, %v489_v17  ;;  %v923_v23 = vsel %vm1554_vm2, 1.0, %v1252_v25  ;;  %v924_v28 = vsel %vm1558_vm3, 1.0, %v1252_v25 }
  0x9f   : > { %1043 = vpow2.f32 %v490_v24  ;;  %vm371_vm5 = vcmp.gt.f32.partialorder %v1512_v38, 0.0  ;;  %vm372_vm6 = vcmp.gt.f32.partialorder %v1514_v39, 0.0  ;;  %v472_v31 = vmax.f32 %v1566_v46, 0.0 }
  0xa0   : > { %v473_v32 = vmax.f32 %v1573_v51, 0.0  ;;  %v474_v33 = vmul.f32 %v1544_v40, %v338_v18  ;;  %1045 = vpow2.f32 %v492_v27  ;;  %v1028_v34 = vpop.eup %1027  ;;  %vm373_vm7 = vcmp.gt.f32.partialorder %v1517_v44, 0.0 }
  0xa1   : > { %v475_v35 = vmul.f32 %v1563_v45, %v339_v19  ;;  %1047 = vpow2.f32 %v494_v29  ;;  %v652_v36 = vrot.slane %v921_v26, 4  ;;  %v658_v12 = vrot.slane %v922_v22, 4  ;;  %v1030_v13 = vpop.eup %1029 }
  0xa2   : > { %v446_v42 = vadd.f32 1.0, %v1028_v34  ;;  %1049 = vpow2.f32 %v496_v30  ;;  %v664_v15 = vrot.slane %v923_v23, 4  ;;  %v670_v43 = vrot.slane %v924_v28, 4 }
  0xa3   : > { %v1032_v47 = vpop.eup %1031  ;;  %v447_v50 = vadd.f32 1.0, %v1030_v13  ;;  %v476_v18 = vmul.f32 %v1566_v46, %v340_v20  ;;  %v653_v54 = vadd.f32 %v921_v26, %v652_v36  ;;  %v659_v55 = vadd.f32 %v922_v22, %v658_v12 }
  0xa4   : > { %v1034_v57 = vpop.eup %1033  ;;  %1051 = vlog2.f32 %v446_v42  ;;  %v477_v10 = vmul.f32 %v1573_v51, %v341_v21  ;;  %v665_v19 = vadd.f32 %v923_v23, %v664_v15  ;;  %v671_v45 = vadd.f32 %v924_v28, %v670_v43 }
  0xa5   : > { %v1036_v58 = vpop.eup %1035  ;;  %v448_v60 = vadd.f32 1.0, %v1034_v57  ;;  %1053 = vlog2.f32 %v447_v50  ;;  %v654_v61 = vrot.slane %v653_v54, 2  ;;  %v660_v62 = vrot.slane %v659_v55, 2 }
  0xa6   : > { %v1038_v63 = vpop.eup %1037  ;;  %v1617_v0 = vsub.f32 %v470_v56, %v474_v33  ;;  %v1619_v20 = vsub.f32 %v471_v59, %v475_v35  ;;  %v925_v11 = vsel %vm370_vm4, 1.0, %v1252_v25  ;;  %v666_v46 = vrot.slane %v665_v19, 2 }
  0xa7   : > { %v1040_v21 = vpop.eup %1039  ;;  %v407_v51 = vmul.f32 0.6931472, %v1032_v47  ;;  %v449_v1 = vadd.f32 1.0, %v1038_v63  ;;  %1055 = vlog2.f32 %v448_v60  ;;  %v672_v7 = vrot.slane %v671_v45, 2 }
  0xa8   : > { %v1042_v8 = vpop.eup %1041  ;;  %v1624_v16 = vsub.f32 %v472_v31, %v476_v18  ;;  %v1626_v17 = vsub.f32 %v473_v32, %v477_v10  ;;  %v655_v40 = vadd.f32 %v654_v61, %v653_v54  ;;  %v661_v56 = vadd.f32 %v660_v62, %v659_v55 }
  0xa9   : > { %v1044_v24 = vpop.eup %1043  ;;  %1057 = vlog2.f32 %v449_v1  ;;  %v926_v59 = vsel %vm371_vm5, 1.0, %v1252_v25  ;;  %v927_v26 = vsel %vm372_vm6, 1.0, %v1252_v25  ;;  %v676_v27 = vrot.slane %v925_v11, 4 }
  0xaa   : > { %v1046_v29 = vpop.eup %1045  ;;  %v409_v22 = vmul.f32 0.6931472, %v1036_v58  ;;  %v498_v30 = vadd.f32 1.0, %v1044_v24  ;;  %v928_v23 = vsel %vm373_vm7, 1.0, %v1252_v25  ;;  %v667_v28 = vadd.f32 %v666_v46, %v665_v19 }
  0xab   : > { %v1048_v31 = vpop.eup %1047  ;;  %v411_v32 = vmul.f32 0.6931472, %v1040_v21  ;;  %v414_v33 = vadd.f32 %v407_v51, %v1526_v2  ;;  %v499_v34 = vadd.f32 1.0, %v1046_v29  ;;  %v673_v35 = vadd.f32 %v672_v7, %v671_v45 }
  0xac   : > { %v1050_v36 = vpop.eup %1049  ;;  %v500_v12 = vadd.f32 1.0, %v1048_v31  ;;  %1059 = vlog2.f32 %v498_v30  ;;  %v656_v13 = vrot.slane %v655_v40, 1  ;;  %v662_v42 = vrot.slane %v661_v56, 1 }
  0xad   : > { %v501_v15 = vadd.f32 1.0, %v1050_v36  ;;  %1061 = vlog2.f32 %v499_v34  ;;  %v677_v43 = vadd.f32 %v925_v11, %v676_v27  ;;  %v682_v47 = vrot.slane %v926_v59, 4 }
  0xae   : > { %v1052_v50 = vpop.eup %1051  ;;  %v413_v18 = vmul.f32 0.6931472, %v1042_v8  ;;  %1063 = vlog2.f32 %v500_v12  ;;  %v668_v25 = vrot.slane %v667_v28, 1  ;;  %v688_v54 = vrot.slane %v927_v26, 4 }
  0xaf   : > { %v1054_v55 = vpop.eup %1053  ;;  %v451_v57 = vmul.f32 0.6931472, %v1052_v50  ;;  %1065 = vlog2.f32 %v501_v15  ;;  %v678_v2 = vrot.slane %v677_v43, 2  ;;  %v694_v10 = vrot.slane %v928_v23, 4 }
  0xb0   : > { %v415_v19 = vadd.f32 %v409_v22, %v1528_v4  ;;  %v453_v45 = vmul.f32 0.6931472, %v1054_v55  ;;  %v1639_v58 = vadd.f32 %v656_v13, %v655_v40  ;;  %v674_v60 = vrot.slane %v673_v35, 1 }
  0xb1   : > { %v1056_v61 = vpop.eup %1055  ;;  %v458_v62 = vadd.f32 %v451_v57, %v1568_v48  ;;  %v1642_v63 = vadd.f32 %v662_v42, %v661_v56  ;;  %v683_v11 = vadd.f32 %v926_v59, %v682_v47  ;;  %v689_v46 = vadd.f32 %v927_v26, %v688_v54 }
  0xb2   : > { %v416_v21 = vadd.f32 %v411_v32, %v1530_v5  ;;  %v417_v51 = vadd.f32 %v413_v18, %v1532_v6  ;;  %v455_v1 = vmul.f32 0.6931472, %v1056_v61  ;;  %v459_v7 = vadd.f32 %v453_v45, %v1570_v49 }
  0xb3   : > { %v1058_v8 = vpop.eup %1057  ;;  %v462_v4 = vadd.f32 %v458_v62, %v414_v33  ;;  %v1647_v24 = vadd.f32 %v668_v25, %v667_v28  ;;  %v1649_v40 = vadd.f32 %v678_v2, %v677_v43  ;;  %v695_v27 = vadd.f32 %v928_v23, %v694_v10 }
  0xb4   : > { %v457_v29 = vmul.f32 0.6931472, %v1058_v8  ;;  %v460_v48 = vadd.f32 %v455_v1, %v1575_v52  ;;  %v463_v56 = vadd.f32 %v459_v7, %v415_v19  ;;  %v1652_v59 = vadd.f32 %v674_v60, %v673_v35 }
  0xb5   : > { %v466_v5 = vsel %vm1546_vm0, %v462_v4, 0.0  ;;  %v684_v6 = vrot.slane %v683_v11, 2  ;;  %v690_v26 = vrot.slane %v689_v46, 2  ;;  %v720_v49 = vcombine.low %v1639_v58, %v1642_v63 }
  0xb6   : > { %v1060_v22 = vpop.eup %1059  ;;  %v461_v30 = vadd.f32 %v457_v29, %v1577_v53  ;;  %v464_v28 = vadd.f32 %v460_v48, %v416_v21  ;;  %v467_v23 = vsel %vm1550_vm1, %v463_v56, 0.0  ;;  %v604_v31 = vrot.slane %v466_v5, 4 }
  0xb7   : > { %v1062_v52 = vpop.eup %1061  ;;  %v503_v32 = vmul.f32 0.6931472, %v1060_v22  ;;  %v610_v33 = vrot.slane %v467_v23, 4  ;;  %v680_v34 = vrot.slane %v1649_v40, 1  ;;  %v696_v41 = vrot.slane %v695_v27, 2 }
  0xb8   : > { %v1064_v35 = vpop.eup %1063  ;;  %v465_v36 = vadd.f32 %v461_v30, %v417_v51  ;;  %v468_v12 = vsel %vm1554_vm2, %v464_v28, 0.0  ;;  %v505_v13 = vmul.f32 0.6931472, %v1062_v52  ;;  %v605_v42 = vadd.f32 %v604_v31, %v466_v5 }
  0xb9   : > { %v1066_v15 = vpop.eup %1065  ;;  %v507_v53 = vmul.f32 0.6931472, %v1064_v35  ;;  %v510_v43 = vadd.f32 %v503_v32, %v1617_v0  ;;  %v611_v3 = vadd.f32 %v610_v33, %v467_v23  ;;  %v616_v47 = vrot.slane %v468_v12, 4 }
  0xba   : > { %v469_v50 = vsel %vm1558_vm3, %v465_v36, 0.0  ;;  %v509_v18 = vmul.f32 0.6931472, %v1066_v15  ;;  %v511_v25 = vadd.f32 %v505_v13, %v1619_v20  ;;  %v606_v54 = vrot.slane %v605_v42, 2 }
  0xbb   : > { %v512_v55 = vadd.f32 %v507_v53, %v1624_v16  ;;  %v514_v14 = vsel %vm370_vm4, %v510_v43, 0.0  ;;  %v612_v57 = vrot.slane %v611_v3, 2  ;;  %v617_v2 = vadd.f32 %v616_v47, %v468_v12 }
  0xbc   : > { %v513_v10 = vadd.f32 %v509_v18, %v1626_v17  ;;  %v515_v0 = vsel %vm371_vm5, %v511_v25, 0.0  ;;  %v622_v19 = vrot.slane %v469_v50, 4  ;;  %v685_v45 = vadd.f32 %v684_v6, %v683_v11 }
  0xbd   : > { %v516_v9 = vsel %vm372_vm6, %v512_v55, 0.0  ;;  %v607_v60 = vadd.f32 %v606_v54, %v605_v42  ;;  %v618_v20 = vrot.slane %v617_v2, 2  ;;  %v628_v61 = vrot.slane %v514_v14, 4 }
  0xbe   : > { %v517_v16 = vsel %vm373_vm7, %v513_v10, 0.0  ;;  %v613_v37 = vadd.f32 %v612_v57, %v611_v3  ;;  %v623_v62 = vadd.f32 %v622_v19, %v469_v50  ;;  %v634_v21 = vrot.slane %v515_v0, 4 }
  0xbf   : > { %v619_v51 = vadd.f32 %v618_v20, %v617_v2  ;;  %v629_v1 = vadd.f32 %v628_v61, %v514_v14  ;;  %v640_v17 = vrot.slane %v516_v9, 4  ;;  %v691_v7 = vadd.f32 %v690_v26, %v689_v46 }
  0xc0   : > { %v624_v38 = vrot.slane %v623_v62, 2  ;;  %v635_v8 = vadd.f32 %v634_v21, %v515_v0  ;;  %v646_v4 = vrot.slane %v517_v16, 4  ;;  %v697_v11 = vadd.f32 %v696_v41, %v695_v27 }
  0xc1   : > { %v608_v29 = vrot.slane %v607_v60, 1  ;;  %v630_v39 = vrot.slane %v629_v1, 2  ;;  %v641_v48 = vadd.f32 %v640_v17, %v516_v9  ;;  %v686_v56 = vrot.slane %v685_v45, 1 }
  0xc2   : > { %v614_v5 = vrot.slane %v613_v37, 1  ;;  %v625_v6 = vadd.f32 %v624_v38, %v623_v62  ;;  %v636_v22 = vrot.slane %v635_v8, 2  ;;  %v647_v44 = vadd.f32 %v646_v4, %v517_v16 }
  0xc3   : > { %v620_v30 = vrot.slane %v619_v51, 1  ;;  %v631_v28 = vadd.f32 %v630_v39, %v629_v1  ;;  %v642_v23 = vrot.slane %v641_v48, 2  ;;  %v692_v31 = vrot.slane %v691_v7, 1 }
  0xc4   : > { %v626_v52 = vrot.slane %v625_v6, 1  ;;  %v637_v32 = vadd.f32 %v636_v22, %v635_v8  ;;  %v648_v33 = vrot.slane %v647_v44, 2  ;;  %v698_v46 = vrot.slane %v697_v11, 1 }
  0xc5   : > { %v632_v26 = vrot.slane %v631_v28, 1  ;;  %v643_v35 = vadd.f32 %v642_v23, %v641_v48  ;;  %v681_v27 = vadd.f32 %v680_v34, %v1649_v40  ;;  %v687_v41 = vadd.f32 %v686_v56, %v685_v45 }
  0xc6   : > { %v609_v36 = vadd.f32 %v608_v29, %v607_v60  ;;  %v615_v12 = vadd.f32 %v614_v5, %v613_v37  ;;  %v638_v13 = vrot.slane %v637_v32, 1  ;;  %v649_v42 = vadd.f32 %v648_v33, %v647_v44 }
  0xc7   : > { %v621_v15 = vadd.f32 %v620_v30, %v619_v51  ;;  %v633_v53 = vadd.f32 %v632_v26, %v631_v28  ;;  %v644_v43 = vrot.slane %v643_v35, 1  ;;  %v693_v3 = vadd.f32 %v692_v31, %v691_v7 }
  0xc8   : > { %v627_v47 = vadd.f32 %v626_v52, %v625_v6  ;;  %v639_v50 = vadd.f32 %v638_v13, %v637_v32  ;;  %v650_v18 = vrot.slane %v649_v42, 1  ;;  %v699_v25 = vadd.f32 %v698_v46, %v697_v11 }
  0xc9   : > { %v645_v54 = vadd.f32 %v644_v43, %v643_v35  ;;  %v721_v55 = vcombine.low %v1647_v24, %v1652_v59  ;;  %v716_v40 = vcombine.low %v609_v36, %v615_v12  ;;  %v722_v57 = vcombine.low %v681_v27, %v687_v41 }
  0xca   : > { %v651_v14 = vadd.f32 %v650_v18, %v649_v42  ;;  %v718_v34 = vcombine.low %v633_v53, %v639_v50  ;;  %vm727_vm9 = vcmask 1045509   ;;  %v729_v2 = vrot.slane %v720_v49, 6 }
  0xcb   : > { %v717_v10 = vcombine.low %v621_v15, %v627_v47  ;;  %v723_v19 = vcombine.low %v693_v3, %v699_v25  ;;  %vm730_vm10 = vcmask 1042434   ;;  %vm732_vm11 = vcmask 1046534  }
  0xcc   : > { %v719_v0 = vcombine.low %v645_v54, %v651_v14  ;;  %v724_v45 = vrot.slane %v718_v34, 7  ;;  %v734_v59 = vrot.slane %v722_v57, 5  ;;  %v742_v60 = vrot.slane %v721_v55, 6 }
  0xcd   : > { %vm735_vm12 = vcmask 1043459   ;;  %vm737_vm13 = vcmask 1047559   ;;  %v745_v63 = vrot.slane %v723_v19, 5 }
  0xce   : > { %v726_v24 = vsel %vm725_vm8, %v724_v45, %v716_v40  ;;  %v739_v9 = vrot.slane %v719_v0, 7 }
  0xcf   : > { %v728_v20 = vsel %vm727_vm9, %v724_v45, %v726_v24 }
  0xd0   : > { %v731_v61 = vsel %vm730_vm10, %v729_v2, %v728_v20  ;;  %v740_v58 = vsel %vm725_vm8, %v739_v9, %v717_v10 }
  0xd1   : > { %v733_v49 = vsel %vm732_vm11, %v729_v2, %v731_v61  ;;  %v741_v16 = vsel %vm727_vm9, %v739_v9, %v740_v58 }
  0xd2   : > { %v736_v37 = vsel %vm735_vm12, %v734_v59, %v733_v49  ;;  %v743_v62 = vsel %vm730_vm10, %v742_v60, %v741_v16 }
  0xd3   : > { %v738_v21 = vsel %vm737_vm13, %v734_v59, %v736_v37  ;;  %v744_v51 = vsel %vm732_vm11, %v742_v60, %v743_v62 }
  0xd4   : > { %v746_v1 = vsel %vm735_vm12, %v745_v63, %v744_v51  ;;  %750 = vst [vmem:[%s287_s8] sm:$0xff] %v738_v21 }
  0xd5   : > { %v747_v17 = vsel %vm737_vm13, %v745_v63, %v746_v1 }
  0xd6   : > { %751 = vst [vmem:[%s287_s8 + $0x8] sm:$0xff] %v747_v17 }
  0xd7   : > { %1170 = shalt.err (!%p1167_p13)
}
  0xd8   : > { %s1171_s7 = scalar_lea.hbm %s1698_s29, 256  ;;  %s1175_s17 = scalar_lea.hbm %s1751_s3, 512 }
  0xd9   : > { %p1172_p8 = scmp.ne.s32.totalorder %s1698_s29, %s1171_s7  ;;  %p1176_p5 = scmp.lt.u32.totalorder %s1698_s29, %s1751_s3 }
  0xda   : > { %p1177_p1 = scmp.lt.u32.totalorder %s1175_s17, %s1171_s7  ;;  %p1179_p0 = scmp.lt.u32.totalorder %s1171_s7, %s1698_s29 }
  0xdb   : > { %p1173_p7 = pnand %p1172_p8, %p1788_p6 }
  0xdc   : > { %p1178_p2 = por %p1177_p1, %p1176_p5 }
  0xdd   : > { %p1174_p3 = pneg %p1173_p7 }
  0xde   : > { %p1180_p12 = por %p1179_p0, %p1178_p2 }
  0xe0   : > { %p1181_p4 = pnand %p1180_p12, %p1174_p3 }
  0xe2   : > { %1184 = shalt.err (!%p1181_p4)
}
  0xe3   : > { %948 = dma.vmem_to_hbm [thread:$0]  (%p1788_p6), %s1700_s6, 256, %s1698_s29, %s753_s15  }
  0xe4 PF: > { %s1789_s27 = sld [smem:[#allocation17_spill]]  ;;  %s1790_s0 = sld [smem:[#allocation14_spill]] }
  0xe5   : > { %s779_s4 = sand.u32 1, %s1223_s12  }
  0xe6   : > { %s780_s11 = scalar_lea.sflag [#allocation5], %s779_s4 }
  0xea   : > { %p1791_p9 = scmp.ne.s32.totalorder %s1789_s27, 0  ;;  %p1792_p11 = scmp.ge.s32.totalorder %s1790_s0, 2 }
  0xec   : > { %p961_p10 = pnand %p1792_p11, %p1791_p9 }
  0xee   : > { %1218 = dma.done.wait (!%p961_p10), %s780_s11, 256  }
  0xef   : > { %1220 = vsyncadd (!%p961_p10), %s780_s11, 4294967040  ;;  %s22_s17 = sadd.s32 1, %s1790_s0   ;;  %s1793_s21 = sld [smem:[#allocation13_spill]] }
  0xf0   : > { %p19_p13 = scmp.ge.s32.totalorder %s22_s17, 4   ;;  %s1794_s14 = sld [smem:[#allocation16_spill]] }
  0xf1   : > { %s1795_s25 = sld [smem:[#allocation15_spill]]  ;;  %s1796_s12 = smov %s1227_s13 }
  0xf2   : > { %s1798_s15 = smov %s1239_s16  ;;  %21 = sbr.rel (!%p19_p13) target bundleno = 11 (0xb), region = 116 }
  0xf5   : > { %s1797_s13 = smov %s1793_s21 }
  0xf7   : > { %s1799_s16 = smov %s1795_s25 }
  0xf9   :  { %785 = vsyncpa [#allocation4], 1 }
  0xfa   :  { %787 = vsyncpa [#allocation4 + $0x1], 1 }
  0xfb   :  { %788 = vsyncpa [#allocation7], 1 }
  0xfc   :  { %790 = vsyncpa [#allocation7 + $0x1], 1 }
  0xfd   :  { %791 = vsyncpa [#allocation5], 1 }
  0xfe   :  { %793 = vsyncpa [#allocation5 + $0x1], 1 }

</bundles_post_ra>
